<compile_context>
chip_gen: v7x
topology: tpu7x:2x2x1
jax: 0.10.0
libtpu: 0.0.40
codegen_flags: <defaults>
</compile_context>

<pallas_src>
import functools

import jax
import jax.numpy as jnp
from jax.experimental import pallas as pl
from jax.experimental.pallas import tpu as pltpu


def _label_smoothing_kernel(x_ref, t_ref, out_ref, *,
                            confidence, smoothing, n_rows, tile_n,
                            tiles_per_split):
    p = pl.program_id(0)   # parallel split (only >1 on dual-TC chips)
    i = pl.program_id(1)   # arbitrary accumulation axis (row tiles)

    # Output block for split p is resident across the whole i sweep.
    @pl.when(i == 0)
    def _():
        out_ref[...] = jnp.zeros_like(out_ref)

    x = x_ref[...].astype(jnp.float32)      # (tile_n, C) — compute in f32
    tgt = t_ref[...]                        # (tile_n, 1) int32
    C = x.shape[-1]

    # Row-validity mask: partial last tile + clamped duplicate tiles when
    # tiles_total does not divide evenly across splits.
    blk = p * tiles_per_split + i           # UNclamped logical block index
    row_ids = blk * tile_n + jax.lax.broadcasted_iota(jnp.int32, (tile_n, 1), 0)
    valid = row_ids < n_rows                # (tile_n, 1) bool

    # Stable log-sum-exp (logprobs never materialized).
    m = jnp.max(x, axis=-1, keepdims=True)
    lse = m + jnp.log(jnp.sum(jnp.exp(x - m), axis=-1, keepdims=True))

    # Weighted reduction without materializing w:
    #   loss_r = lse_r - [ confidence * x[r, tgt_r] + (smoothing/C) * sum_c x[r,c] ]
    col = jax.lax.broadcasted_iota(jnp.int32, (1, C), 1)            # (1, C)
    x_tgt = jnp.sum(jnp.where(col == tgt, x, 0.0), axis=-1, keepdims=True)
    x_sum = jnp.sum(x, axis=-1, keepdims=True)
    loss = lse - (confidence * x_tgt + (smoothing / C) * x_sum)      # (tile_n, 1)

    # Single per-step reduce into the tiny resident output block.
    # NOTE: keep the mask as a select; padded-row garbage must not propagate.
    step_sum = jnp.sum(jnp.where(valid, loss, 0.0), axis=0, keepdims=True)  # (1,1)
    out_ref[...] += step_sum[None]                                          # (1,1,1)


def _round_up(v, m):
    return ((v + m - 1) // m) * m


def _sublane_mult(itemsize):
    return 8 if itemsize >= 4 else (16 if itemsize == 2 else 32)


def _choose_tile_n(n, c, itemsize, vmem_budget_bytes):
    """Largest row tile whose steady-state VMEM footprint fits the budget."""
    # per-row bytes:
    #   2x double-buffered input row (C * itemsize)
    # + ~4 f32 (C,) temps (upcast, x - m, exp, masked-select path)
    # + lane-padded (.,1)->(.,128) int32 target rows (double-buffered).
    per_row = 2 * c * itemsize + 4 * c * 4 + 2 * 128 * 4
    tile = vmem_budget_bytes // max(per_row, 1)
    mult = _sublane_mult(itemsize)
    tile = max(mult, (tile // mult) * mult)
    tile = min(tile, 2048)                           # diminishing returns past ~2K
    tile = min(tile, _round_up(max(n, 1), mult))     # don't exceed the batch
    return int(tile)


def _num_tensorcores():
    """Best-effort TensorCores-per-device (2 on megacore/dual-TC chips)."""
    try:
        kind = jax.devices()[0].device_kind.lower()
    except Exception:
        return 1
    if "lite" in kind or "v5e" in kind or "v6e" in kind:
        return 1
    for tag in ("v4", "v5p", "v7"):
        if tag in kind:
            return 2
    return 1


def label_smoothing_loss(x, target, smoothing=0.1, tile_n=None):
    """x: [N, C] float logits; target: [N] int class ids. Returns scalar f32 loss."""
    N, C = x.shape
    confidence = 1.0 - smoothing
    target2d = target.astype(jnp.int32).reshape(N, 1)

    # Generation-aware VMEM budget (v7x: 64 MiB physical; v5e/v6e: 128 MiB).
    try:
        vmem_cap = int(pltpu.get_tpu_info().vmem_capacity_bytes)
    except Exception:
        vmem_cap = 64 * 1024 * 1024
    vmem_limit = int(vmem_cap * 3 // 4)

    mult = _sublane_mult(x.dtype.itemsize)
    if tile_n is None:
        tile_n = _choose_tile_n(N, C, x.dtype.itemsize, vmem_limit)
    assert tile_n % mult == 0, (
        f"tile_n must be a multiple of {mult} for dtype {x.dtype}")

    tiles_total = pl.cdiv(N, tile_n)
    # Only split across cores on dual-TC chips; on single-TC chips the split is
    # a serialized, fully-masked duplicate HBM tile — skip it.
    n_splits = 2 if (_num_tensorcores() >= 2 and tiles_total >= 2) else 1
    tiles_per_split = pl.cdiv(tiles_total, n_splits)

    kernel = functools.partial(
        _label_smoothing_kernel,
        confidence=confidence, smoothing=smoothing, n_rows=N,
        tile_n=tile_n, tiles_per_split=tiles_per_split)

    def blk_map(p, i):
        # Clamp so out-of-range split/step pairs re-read the last real tile
        # (their contribution is fully masked out inside the kernel).
        return (jnp.minimum(p * tiles_per_split + i, tiles_total - 1), 0)

    partial_sums = pl.pallas_call(
        kernel,
        out_shape=jax.ShapeDtypeStruct((n_splits, 1, 1), jnp.float32),
        grid_spec=pltpu.PrefetchScalarGridSpec(
            num_scalar_prefetch=0,
            grid=(n_splits, tiles_per_split),
            in_specs=[
                pl.BlockSpec((tile_n, C), blk_map),
                pl.BlockSpec((tile_n, 1), blk_map),
            ],
            out_specs=pl.BlockSpec((1, 1, 1), lambda p, i: (p, 0, 0)),
        ),
        compiler_params=pltpu.CompilerParams(
            dimension_semantics=("parallel", "arbitrary"),
            vmem_limit_bytes=vmem_limit),
    )(x, target2d)

    # Tiny final reduce (n_splits scalars) + mean over rows.
    return jnp.sum(partial_sums) / jnp.float32(N)


def _reference(x, target, smoothing=0.1):
    confidence = 1.0 - smoothing
    logprobs = jax.nn.log_softmax(x.astype(jnp.float32), axis=-1)
    nll = -jnp.take_along_axis(logprobs, target[:, None].astype(jnp.int32), axis=-1)[:, 0]
    smooth = -jnp.mean(logprobs, axis=-1)
    return jnp.mean(confidence * nll + smoothing * smooth)


if __name__ == "__main__":
    key = jax.random.PRNGKey(0)

    # Test 1: small shape consistent with the module, default (auto) tiling.
    kx, kt, key = jax.random.split(key, 3)
    N, C = 16, 32
    x = jax.random.normal(kx, (N, C), dtype=jnp.float32)
    target = jax.random.randint(kt, (N,), 0, C, dtype=jnp.int32)
    loss = jax.block_until_ready(label_smoothing_loss(x, target, smoothing=0.1))
    ref = _reference(x, target, smoothing=0.1)
    assert jnp.allclose(loss, ref, atol=1e-5, rtol=1e-5), (loss, ref)

    # Test 2: non-divisible batch + multiple tiles (exercises the row mask, the
    # clamped index_map and — on dual-TC chips — the parallel-split path).
    kx2, kt2 = jax.random.split(key)
    N2, C2 = 20, 32
    x2 = jax.random.normal(kx2, (N2, C2), dtype=jnp.float32)
    target2 = jax.random.randint(kt2, (N2,), 0, C2, dtype=jnp.int32)
    loss2 = jax.block_until_ready(
        label_smoothing_loss(x2, target2, smoothing=0.1, tile_n=8))
    ref2 = _reference(x2, target2, smoothing=0.1)
    assert jnp.allclose(loss2, ref2, atol=1e-5, rtol=1e-5), (loss2, ref2)

    print("KERNEL_OK")
</pallas_src>

<mosaic_0001>
module attributes {stable_mosaic.version = 11 : i64} {
  func.func @_label_smoothing_kernel(%arg0: i32, %arg1: i32, %arg2: memref<16x32xf32, #tpu.memory_space<vmem>>, %arg3: memref<16x1xi32, #tpu.memory_space<vmem>>, %arg4: memref<1x1x1xf32, #tpu.memory_space<vmem>>) attributes {dimension_semantics = [#tpu.dimension_semantics<parallel>, #tpu.dimension_semantics<arbitrary>], iteration_bounds = array<i64: 1, 1>, scalar_prefetch = 0 : i64, scratch_operands = 0 : i64, tpu.core_type = #tpu.core_type<tc>, window_params = [{transform_indices = @transform_0, window_bounds = array<i64: 16, 32>}, {transform_indices = @transform_1, window_bounds = array<i64: 16, 1>}, {transform_indices = @transform_2, window_bounds = array<i64: 1, 1, 1>}]} {
    %c0_i32 = arith.constant 0 : i32
    %0 = arith.cmpi eq, %arg1, %c0_i32 : i32
    %1 = arith.extui %0 : i1 to i32
    %c0_i32_0 = arith.constant 0 : i32
    %2 = arith.cmpi ne, %1, %c0_i32_0 : i32
    scf.if %2 {
      %cst_19 = arith.constant 0.000000e+00 : f32
      %46 = vector.broadcast %cst_19 : f32 to vector<1x1x1xf32>
      %c0_20 = arith.constant 0 : index
      %c0_21 = arith.constant 0 : index
      %c0_22 = arith.constant 0 : index
      %47 = vector.load %arg4[%c0_20, %c0_21, %c0_22] : memref<1x1x1xf32, #tpu.memory_space<vmem>>, vector<1x1x1xf32>
      tpu.vector_store %arg4[%c0_20, %c0_21, %c0_22], %46 {strides = array<i32>} : memref<1x1x1xf32, #tpu.memory_space<vmem>>, vector<1x1x1xf32>,
    } else {
    }
    %c0 = arith.constant 0 : index
    %c0_1 = arith.constant 0 : index
    %3 = vector.load %arg2[%c0, %c0_1] : memref<16x32xf32, #tpu.memory_space<vmem>>, vector<16x32xf32>
    %c0_2 = arith.constant 0 : index
    %c0_3 = arith.constant 0 : index
    %4 = vector.load %arg3[%c0_2, %c0_3] : memref<16x1xi32, #tpu.memory_space<vmem>>, vector<16x1xi32>
    %c1_i32 = arith.constant 1 : i32
    %5 = arith.muli %arg0, %c1_i32 : i32
    %6 = arith.addi %5, %arg1 : i32
    %c16_i32 = arith.constant 16 : i32
    %7 = arith.muli %6, %c16_i32 : i32
    %8 = tpu.iota {dimensions = array<i32: 0>} : vector<16x1xi32>
    %9 = vector.broadcast %7 : i32 to vector<16x1xi32>
    %10 = arith.addi %9, %8 : vector<16x1xi32>
    %c16_i32_4 = arith.constant 16 : i32
    %11 = vector.broadcast %c16_i32_4 : i32 to vector<16x1xi32>
    %12 = arith.cmpi slt, %10, %11 : vector<16x1xi32>
    %cst = arith.constant dense<0xFF800000> : vector<16xf32>
    %13 = vector.multi_reduction <maximumf>, %3, %cst [1] : vector<16x32xf32> to vector<16xf32>
    %14 = vector.shape_cast %13 : vector<16xf32> to vector<16x1xf32>
    %15 = vector.broadcast %14 : vector<16x1xf32> to vector<16x32xf32>
    %16 = arith.subf %3, %15 : vector<16x32xf32>
    %17 = math.exp %16 : vector<16x32xf32>
    %cst_5 = arith.constant dense<0.000000e+00> : vector<16xf32>
    %18 = vector.multi_reduction <add>, %17, %cst_5 [1] : vector<16x32xf32> to vector<16xf32>
    %19 = vector.shape_cast %18 : vector<16xf32> to vector<16x1xf32>
    %20 = math.log %19 : vector<16x1xf32>
    %21 = arith.addf %14, %20 : vector<16x1xf32>
    %22 = tpu.iota {dimensions = array<i32: 1>} : vector<1x32xi32>
    %23 = vector.broadcast %22 : vector<1x32xi32> to vector<16x32xi32>
    %24 = vector.broadcast %4 : vector<16x1xi32> to vector<16x32xi32>
    %25 = arith.cmpi eq, %23, %24 : vector<16x32xi32>
    %cst_6 = arith.constant 0.000000e+00 : f32
    %26 = vector.broadcast %cst_6 : f32 to vector<16x32xf32>
    %27 = arith.select %25, %3, %26 : vector<16x32xi1>, vector<16x32xf32>
    %cst_7 = arith.constant dense<0.000000e+00> : vector<16xf32>
    %28 = vector.multi_reduction <add>, %27, %cst_7 [1] : vector<16x32xf32> to vector<16xf32>
    %29 = vector.shape_cast %28 : vector<16xf32> to vector<16x1xf32>
    %cst_8 = arith.constant dense<0.000000e+00> : vector<16xf32>
    %30 = vector.multi_reduction <add>, %3, %cst_8 [1] : vector<16x32xf32> to vector<16xf32>
    %31 = vector.shape_cast %30 : vector<16xf32> to vector<16x1xf32>
    %cst_9 = arith.constant 0.899999976 : f32
    %32 = vector.broadcast %cst_9 : f32 to vector<16x1xf32>
    %33 = arith.mulf %32, %29 : vector<16x1xf32>
    %cst_10 = arith.constant 3.125000e-03 : f32
    %34 = vector.broadcast %cst_10 : f32 to vector<16x1xf32>
    %35 = arith.mulf %34, %31 : vector<16x1xf32>
    %36 = arith.addf %33, %35 : vector<16x1xf32>
    %37 = arith.subf %21, %36 : vector<16x1xf32>
    %cst_11 = arith.constant 0.000000e+00 : f32
    %38 = vector.broadcast %cst_11 : f32 to vector<16x1xf32>
    %39 = arith.select %12, %37, %38 : vector<16x1xi1>, vector<16x1xf32>
    %cst_12 = arith.constant dense<0.000000e+00> : vector<1xf32>
    %40 = vector.multi_reduction <add>, %39, %cst_12 [0] : vector<16x1xf32> to vector<1xf32>
    %41 = vector.shape_cast %40 : vector<1xf32> to vector<1x1xf32>
    %c0_13 = arith.constant 0 : index
    %c0_14 = arith.constant 0 : index
    %c0_15 = arith.constant 0 : index
    %42 = vector.load %arg4[%c0_13, %c0_14, %c0_15] : memref<1x1x1xf32, #tpu.memory_space<vmem>>, vector<1x1x1xf32>
    %43 = vector.shape_cast %41 : vector<1x1xf32> to vector<1x1x1xf32>
    %44 = arith.addf %42, %43 : vector<1x1x1xf32>
    %c0_16 = arith.constant 0 : index
    %c0_17 = arith.constant 0 : index
    %c0_18 = arith.constant 0 : index
    %45 = vector.load %arg4[%c0_16, %c0_17, %c0_18] : memref<1x1x1xf32, #tpu.memory_space<vmem>>, vector<1x1x1xf32>
    tpu.vector_store %arg4[%c0_16, %c0_17, %c0_18], %44 {strides = array<i32>} : memref<1x1x1xf32, #tpu.memory_space<vmem>>, vector<1x1x1xf32>,
    return
  }
  func.func @transform_0(%arg0: i32, %arg1: i32) -> (i32, i32) {
    %c1_i32 = arith.constant 1 : i32
    %0 = arith.muli %arg0, %c1_i32 : i32
    %1 = arith.addi %0, %arg1 : i32
    %c0_i32 = arith.constant 0 : i32
    %2 = arith.minsi %1, %c0_i32 : i32
    %c0_i32_0 = arith.constant 0 : i32
    %c0_i32_1 = arith.constant 0 : i32
    return %2, %c0_i32_0 : i32, i32
  }
  func.func @transform_1(%arg0: i32, %arg1: i32) -> (i32, i32) {
    %c1_i32 = arith.constant 1 : i32
    %0 = arith.muli %arg0, %c1_i32 : i32
    %1 = arith.addi %0, %arg1 : i32
    %c0_i32 = arith.constant 0 : i32
    %2 = arith.minsi %1, %c0_i32 : i32
    %c0_i32_0 = arith.constant 0 : i32
    %c0_i32_1 = arith.constant 0 : i32
    return %2, %c0_i32_0 : i32, i32
  }
  func.func @transform_2(%arg0: i32, %arg1: i32) -> (i32, i32, i32) {
    %c0_i32 = arith.constant 0 : i32
    %c0_i32_0 = arith.constant 0 : i32
    %c0_i32_1 = arith.constant 0 : i32
    return %arg0, %c0_i32, %c0_i32_0 : i32, i32, i32
  }
}

</mosaic_0001>

<bundles_post_ra>
// kernel: tpu_custom_call.1
= control target key start
LH: loop header
LB: loop body
LE: loop exit
PB: predicated region body
PF: predicated region fallthrough
CT: control target
= control target key end

     0   :  { %vm96_vm0 = vcmask 261120   ;;  %v229_v4 = vmov 0   ;;  %s281_s0 = inlined_call_operand.vmem [shape: f32[16,32], index: 0, kind: input, shape index: {}]   ;;  %s282_s1 = inlined_call_operand.vmem [shape: s32[16,1], index: 1, kind: input, shape index: {}]   ;;  %s283_s2 = inlined_call_operand.hbm [shape: f32[1,1,1], index: 2, kind: output, shape index: {}]  }
   0x1   :  { %v82_v0 = vld [vmem:[%s281_s0] sm:$0xff]  ;;  %v83_v1 = vld [vmem:[%s281_s0 + $0x8] sm:$0xff]  ;;  %195 = vset.pattern.permute.xlu1 %v229_v4  ;;  %196 = vset.pattern.permute.xlu0 %v229_v4 }
   0x2   :  { %v84_v2 = vld [vmem:[%s282_s1] sm:$0xff]  ;;  %v97_v3 = vsel %vm96_vm0, %v82_v0, -inf }
   0x3   :  { %7 = vsyncpa [#allocation3], 0  ;;  %98 = vmax.xlane.f32.xlu0 %v97_v3  ;;  %124 = vperm.xlu1 %195, %v84_v2   ;;  %v100_v5 = vsel %vm96_vm0, %v83_v1, -inf  ;;  %v85_v6 = vld [vmem:[%s282_s1 + $0x8] sm:$0xff]  ;;  %v121_v11 = vlaneseq  ;;  %v139_v25 = vsel %vm96_vm0, %v82_v0, 0.0  ;;  %v142_v26 = vsel %vm96_vm0, %v83_v1, 0.0 }
   0x4   :  { %vm80_vm3 = vcmask 0   ;;  %v230_v27 = vmov 0.0   ;;  %s231_s0 = smov [#allocation2]  }
   0x5   :  { %v122_v14 = vand.u32 127, %v121_v11  ;;  %81 = vst.msk [vmem:[#allocation2] sm:$0x1] %vm80_vm3, %v230_v27  ;;  %s172_s1 = sshll.u32 %s231_s0, 4  ;;  %s173_s1 = int_to_ptr.vmem [resolvable:$true] %s172_s1 }
   0x6   :  { %s205_s17 = scalar_lea.vmem %s173_s1, 16  ;;  %s209_s18 = scalar_lea.vmem %s173_s1, 32 }
   0x7   :  { %101 = vmax.xlane.f32.xlu0 %v100_v5  ;;  %127 = vperm.xlu1 %195, %v85_v6   ;;  %p206_p0 = scmp.ne.s32.totalorder %s173_s1, %s205_s17  ;;  %p210_p1 = scmp.lt.s32.totalorder %s173_s1, %s173_s1 }
   0x8   :  { %p211_p2 = scmp.lt.s32.totalorder %s209_s18, %s205_s17 }
   0xa   :  { %p212_p3 = por %p211_p2, %p210_p1 }
   0xc   :  { %v162_v54 = vld [vmem:[#allocation2] sm:$0x1]  ;;  %p213_p4 = pnand %p212_p3, %p206_p0 }
  0x82   :  { %v125_v15 = vpop.permute.xlu1 %124 }
  0x83   :  { %vm129_vm1 = vcmp.eq.s32.totalorder %v122_v14, %v125_v15 }
  0x84   :  { %v131_v18 = vsel %vm129_vm1, %v82_v0, 0.0 }
  0x85   :  { %v133_v20 = vsel %vm96_vm0, %v131_v18, 0.0 }
  0x86   :  { %v128_v17 = vpop.permute.xlu1 %127 }
  0x87   :  { %vm130_vm2 = vcmp.eq.s32.totalorder %v122_v14, %v128_v17 }
  0x88   :  { %v132_v23 = vsel %vm130_vm2, %v83_v1, 0.0 }
  0x89   :  { %v136_v24 = vsel %vm96_vm0, %v132_v23, 0.0 }
  0x90   :  { %v99_v7 = vpop.xlane.xlu0 %98 }
  0x91   :  { %v103_v8 = vsub.f32 %v82_v0, %v99_v7 }
  0x93   :  { %v105_v9 = vmul.f32 1.442695, %v103_v8 }
  0x94   :  { %v102_v10 = vpop.xlane.xlu0 %101 }
  0x95   :  { %197 = vpow2.f32 %v105_v9  ;;  %v104_v12 = vsub.f32 %v83_v1, %v102_v10 }
  0x97   :  { %v107_v13 = vmul.f32 1.442695, %v104_v12 }
  0x99   :  { %199 = vpow2.f32 %v107_v13 }
  0x9f   :  { %v198_v16 = vpop.eup %197 }
  0xa0   :  { %v109_v19 = vsel %vm96_vm0, %v198_v16, 0.0 }
  0xa1   :  { %110 = vadd.xlane.f32.xlu0 %v109_v19 }
  0xa3   :  { %v200_v21 = vpop.eup %199 }
  0xa4   :  { %v112_v22 = vsel %vm96_vm0, %v200_v21, 0.0 }
  0xa5   :  { %134 = vadd.xlane.f32.xlu0 %v133_v20  ;;  %113 = vadd.xlane.f32.xlu1 %v112_v22 }
  0xa9   :  { %137 = vadd.xlane.f32.xlu0 %v136_v24 }
  0xad   :  { %140 = vadd.xlane.f32.xlu0 %v139_v25 }
  0xb1   :  { %143 = vadd.xlane.f32.xlu0 %v142_v26 }
 0x12e   :  { %v111_v28 = vpop.xlane.xlu0 %110 }
 0x12f   :  { %201 = vlog2.f32 %v111_v28 }
 0x132   :  { %v114_v29 = vpop.xlane.xlu1 %113  ;;  %v135_v30 = vpop.xlane.xlu0 %134 }
 0x133   :  { %203 = vlog2.f32 %v114_v29  ;;  %v145_v37 = vmul.f32 0.9, %v135_v30 }
 0x136   :  { %v138_v31 = vpop.xlane.xlu0 %137 }
 0x137   :  { %v146_v41 = vmul.f32 0.9, %v138_v31 }
 0x139   :  { %v202_v32 = vpop.eup %201 }
 0x13a   :  { %v141_v33 = vpop.xlane.xlu0 %140  ;;  %v116_v34 = vmul.f32 0.6931472, %v202_v32 }
 0x13b   :  { %v147_v35 = vmul.f32 0.003125, %v141_v33 }
 0x13c   :  { %v119_v40 = vadd.f32 %v116_v34, %v99_v7 }
 0x13d   :  { %v204_v36 = vpop.eup %203  ;;  %v149_v42 = vadd.f32 %v147_v35, %v145_v37 }
 0x13e   :  { %v118_v38 = vmul.f32 0.6931472, %v204_v36  ;;  %v144_v39 = vpop.xlane.xlu0 %143 }
 0x13f   :  { %v148_v43 = vmul.f32 0.003125, %v144_v39  ;;  %v151_v46 = vsub.f32 %v119_v40, %v149_v42 }
 0x140   :  { %v120_v44 = vadd.f32 %v118_v38, %v102_v10 }
 0x141   :  { %v150_v45 = vadd.f32 %v148_v43, %v146_v41 }
 0x143   :  { %v152_v47 = vsub.f32 %v120_v44, %v150_v45 }
 0x145   :  { %v155_v48 = vadd.f32 %v152_v47, %v151_v46 }
 0x147   :  { %v156_v49 = vrot.slane %v155_v48, 4 }
 0x149   :  { %v157_v50 = vadd.f32 %v156_v49, %v155_v48 }
 0x14b   :  { %v158_v51 = vrot.slane %v157_v50, 2 }
 0x14d   :  { %v159_v52 = vadd.f32 %v158_v51, %v157_v50 }
 0x14f   :  { %v160_v53 = vrot.slane %v159_v52, 1 }
 0x151   :  { %v161_v55 = vadd.f32 %v160_v53, %v159_v52 }
 0x153   :  { %v163_v56 = vadd.f32 %v162_v54, %v161_v55 }
 0x155   :  { %165 = vst.msk [vmem:[#allocation2] sm:$0x1] %vm80_vm3, %v163_v56 }
 0x156   :  { %216 = shalt.err (!%p213_p4)
}
 0x157   :  { %s217_s21 = scalar_lea.hbm %s283_s2, 16 }
 0x158   :  { %p218_p5 = scmp.ne.s32.totalorder %s283_s2, %s217_s21  ;;  %p221_p6 = scmp.lt.u32.totalorder %s217_s21, %s283_s2 }
 0x15a   :  { %p223_p7 = pnand %p221_p6, %p218_p5 }
 0x15c   :  { %226 = shalt.err (!%p223_p7)
}
 0x15d   :  { %175 = dma.vmem_to_hbm [thread:$0]  %s173_s1, 16, %s283_s2, [#allocation3]  }
 0x15e   :  { %227 = dma.done.wait [#allocation3], 16  }
 0x15f   :  { %228 = vsyncadd [#allocation3], 4294967280 }
 0x160   :  { %179 = vsyncpa [#allocation3], 1 }

</bundles_post_ra>
